<compile_context>
chip_gen: v5e
topology: v5e:2x2
jax: 0.10.0
libtpu: 0.0.40
codegen_flags: <defaults>
</compile_context>

<pallas_src>
import functools

import jax
import jax.numpy as jnp
from jax.experimental import pallas as pl
from jax.experimental.pallas import tpu as pltpu


# ---------------------------------------------------------------------------
# Kernels
# ---------------------------------------------------------------------------

def _se_fused_kernel(x_ref, w1t_ref, w2t_ref, o_ref, *, inv_hw):
    """Fused SE block for one (TB, C, HW) tile.

    x_ref: (TB, C, HW)  w1t_ref: (C, Cr)  w2t_ref: (Cr, C)  o_ref: (TB, C, HW)
    """
    # Global average pool, accumulated in float32.
    pooled = jnp.sum(x_ref[...].astype(jnp.float32), axis=-1) * inv_hw      # (TB, C)
    # fc1 (bias-free) + ReLU; fc2 (bias-free) + sigmoid.  Weights were
    # transposed once in the wrapper, so these are plain row-major matmuls.
    h = jnp.maximum(
        jnp.dot(pooled, w1t_ref[...], preferred_element_type=jnp.float32), 0.0)
    s = jax.nn.sigmoid(
        jnp.dot(h, w2t_ref[...], preferred_element_type=jnp.float32))        # (TB, C)
    scale = s.astype(o_ref.dtype)
    # Streaming scale: re-load x (spare vld slots; the binding resources are
    # vst + HBM bandwidth) rather than keeping the pre-FC tile value live.
    o_ref[...] = x_ref[...] * scale[:, :, None]


def _se_scale_kernel(x_ref, s_ref, o_ref):
    """Streaming multiply for the split fallback: (1, C, THW) * (1, C, 1)."""
    o_ref[...] = x_ref[...] * s_ref[...]


# ---------------------------------------------------------------------------
# Wrapper helpers
# ---------------------------------------------------------------------------

_MIB = 1024 * 1024


def _tpu_vmem_and_cores():
    """Per-TensorCore VMEM capacity and TensorCores per chip (best effort)."""
    vmem_cap = 128 * _MIB
    try:
        info = pltpu.get_tpu_info()
        vmem_cap = int(getattr(info, "vmem_capacity_bytes", vmem_cap) or vmem_cap)
    except Exception:
        pass
    # 64 MiB VMEM per core is the v7x-class signature (2 TCs/chip); the
    # 128-MiB-VMEM chips (v5e / v6e) have a single TensorCore.
    num_cores = 2 if vmem_cap <= 64 * _MIB else 1
    return vmem_cap, num_cores


def _pick_batch_tile(B, C, HW, elem_bytes, tile_budget_bytes, num_cores):
    """Batch-tile size TB (a divisor of B), or None if even TB=1 overflows.

    On multi-TensorCore chips: prefer >= 2 pipelined grid steps per core while
    each tile stays >= ~1 MiB, then >= 1 step per core.  On single-core chips:
    just take the largest tile that fits the budget.
    """
    def tile_bytes(tb):
        return tb * C * HW * elem_bytes

    fitting = [d for d in range(B, 0, -1)
               if B % d == 0 and tile_bytes(d) <= tile_budget_bytes]
    if not fitting:
        return None
    if num_cores <= 1:
        return fitting[0]
    min_tile = 1 * _MIB
    for d in fitting:                                   # largest-first
        if B // d >= 2 * num_cores and tile_bytes(d) >= min_tile:
            return d
    for d in fitting:
        if B // d >= num_cores:
            return d
    return fitting[0]


# ---------------------------------------------------------------------------
# Public entry point
# ---------------------------------------------------------------------------

def se_block(x, w1, w2, *, force_split=False):
    """SEBlock forward.  x: (B, C, H, W); w1: (C//r, C); w2: (C, C//r)."""
    B, C, H, W = x.shape
    HW = H * W
    Cr = w1.shape[0]
    elem_bytes = x.dtype.itemsize

    x_flat = x.reshape(B, C, HW)
    # Transpose the FC weights once in the wrapper; the kernel never does
    # per-step XLU work on data that never changes.
    w1_t = jnp.transpose(w1)                             # (C, Cr)
    w2_t = jnp.transpose(w2)                             # (Cr, C)

    # Generation-aware VMEM sizing: ~3/4 of physical VMEM (capped at 96 MiB)
    # for the scoped limit; the per-buffer budget leaves room for 2x(in) +
    # 2x(out) double buffers plus the tiny weights.
    vmem_cap, num_cores = _tpu_vmem_and_cores()
    vmem_limit = min((vmem_cap * 3) // 4, 96 * _MIB)
    tile_budget = vmem_limit // 6

    TB = None if force_split else _pick_batch_tile(
        B, C, HW, elem_bytes, tile_budget, num_cores)
    use_split = force_split or TB is None or (num_cores >= 2 and B // TB < 2)

    if not use_split:
        grid = (B // TB,)
        kernel = functools.partial(_se_fused_kernel, inv_hw=1.0 / float(HW))
        cost = pl.CostEstimate(
            flops=4 * B * C * Cr + 2 * B * C * HW,
            transcendentals=B * C,
            bytes_accessed=(2 * B * C * HW + 2 * C * Cr) * elem_bytes,
        )
        out_flat = pl.pallas_call(
            kernel,
            out_shape=jax.ShapeDtypeStruct((B, C, HW), x.dtype),
            grid_spec=pltpu.PrefetchScalarGridSpec(
                num_scalar_prefetch=0,
                grid=grid,
                in_specs=[
                    # NOTE: if a v7x trace ever shows exposed DMA here, sweep
                    # pipeline_mode=pl.Buffered(3) against a slightly smaller TB.
                    pl.BlockSpec((TB, C, HW), lambda b: (b, 0, 0)),   # x tile
                    pl.BlockSpec((C, Cr), lambda b: (0, 0)),          # fc1.T
                    pl.BlockSpec((Cr, C), lambda b: (0, 0)),          # fc2.T
                ],
                out_specs=pl.BlockSpec((TB, C, HW), lambda b: (b, 0, 0)),
            ),
            compiler_params=pltpu.CompilerParams(
                dimension_semantics=("parallel",),
                vmem_limit_bytes=vmem_limit,
            ),
            cost_estimate=cost,
        )(x_flat, w1_t, w2_t)
        return out_flat.reshape(B, C, H, W)

    # ---- Gated fallback: two-phase split ------------------------------------
    # Phase A (squeeze + excitation): one XLA read pass over x plus O(B*C*Cr)
    # flops — negligible next to the streaming multiply below.
    # TODO(synk): fold phase A into a tiled Pallas reduction kernel if the
    # extra XLA pass over x ever shows up in profiles.
    pooled = jnp.mean(x_flat.astype(jnp.float32), axis=-1)                   # (B, C)
    h_act = jnp.maximum(pooled @ w1_t.astype(jnp.float32), 0.0)              # (B, Cr)
    scale = jax.nn.sigmoid(h_act @ w2_t.astype(jnp.float32)).astype(x.dtype)  # (B, C)
    scale3 = scale[:, :, None]                                               # (B, C, 1)

    # Phase B: streaming multiply with a 2-D parallel grid over batch and HW
    # tiles (keeps both v7x TensorCores busy even at B == 1).
    max_thw = (tile_budget // max(1, C * elem_bytes)) // 128 * 128
    if max_thw < 128:
        # TODO(synk): add channel tiling for extreme C; never hit by SE blocks.
        raise ValueError(
            f"SEBlock kernel: a (1, {C}, 128) block ({C * 128 * elem_bytes} B) "
            f"exceeds the per-buffer VMEM budget ({tile_budget} B).")
    thw = HW if C * HW * elem_bytes <= tile_budget else max_thw
    n_hw = pl.cdiv(HW, thw)

    out_flat = pl.pallas_call(
        _se_scale_kernel,
        out_shape=jax.ShapeDtypeStruct((B, C, HW), x.dtype),
        grid_spec=pltpu.PrefetchScalarGridSpec(
            num_scalar_prefetch=0,
            grid=(B, n_hw),
            in_specs=[
                pl.BlockSpec((1, C, thw), lambda b, t: (b, 0, t)),
                pl.BlockSpec((1, C, 1), lambda b, t: (b, 0, 0)),
            ],
            out_specs=pl.BlockSpec((1, C, thw), lambda b, t: (b, 0, t)),
        ),
        compiler_params=pltpu.CompilerParams(
            dimension_semantics=("parallel", "parallel"),
            vmem_limit_bytes=vmem_limit,
        ),
        cost_estimate=pl.CostEstimate(
            flops=B * C * HW,
            transcendentals=0,
            bytes_accessed=2 * B * C * HW * elem_bytes,
        ),
    )(x_flat, scale3)
    return out_flat.reshape(B, C, H, W)


def _reference(x, w1, w2):
    f = jnp.mean(x, axis=(2, 3))                  # (B, C)
    f = jnp.maximum(f @ w1.T, 0.0)                # (B, C//r)
    f = jax.nn.sigmoid(f @ w2.T)                  # (B, C)
    return x * f[:, :, None, None]


if __name__ == "__main__":
    # Small shapes consistent with the module's forward.
    B, C, H, W = 2, 4, 16, 16
    reduction_ratio = 2
    Cr = C // reduction_ratio

    key = jax.random.PRNGKey(0)
    kx, k1, k2 = jax.random.split(key, 3)
    x = jax.random.normal(kx, (B, C, H, W), dtype=jnp.float32)
    # nn.Linear weights are (out_features, in_features), bias=False.
    w1 = jax.random.normal(k1, (Cr, C), dtype=jnp.float32) * 0.5
    w2 = jax.random.normal(k2, (C, Cr), dtype=jnp.float32) * 0.5

    ref = _reference(x, w1, w2)

    out = jax.block_until_ready(se_block(x, w1, w2))
    assert out.shape == (B, C, H, W)
    assert jnp.allclose(out, ref, atol=1e-5, rtol=1e-5), "fused path mismatch vs reference"

    # Also exercise the gated two-kernel fallback so the split path stays correct.
    out_split = jax.block_until_ready(se_block(x, w1, w2, force_split=True))
    assert jnp.allclose(out_split, ref, atol=1e-5, rtol=1e-5), "split path mismatch vs reference"

    print("KERNEL_OK")
</pallas_src>

<mosaic_0001>
module attributes {stable_mosaic.version = 11 : i64} {
  func.func @_se_fused_kernel(%arg0: i32, %arg1: memref<2x4x256xf32, #tpu.memory_space<vmem>>, %arg2: memref<4x2xf32, #tpu.memory_space<vmem>>, %arg3: memref<2x4xf32, #tpu.memory_space<vmem>>, %arg4: memref<2x4x256xf32, #tpu.memory_space<vmem>>) attributes {dimension_semantics = [#tpu.dimension_semantics<parallel>], iteration_bounds = array<i64: 1>, scalar_prefetch = 0 : i64, scratch_operands = 0 : i64, tpu.core_type = #tpu.core_type<tc>, window_params = [{transform_indices = @transform_0, window_bounds = array<i64: 2, 4, 256>}, {pipeline_mode = #tpu.pipeline_mode<synchronous>, transform_indices = @transform_1, window_bounds = array<i64: 4, 2>}, {pipeline_mode = #tpu.pipeline_mode<synchronous>, transform_indices = @transform_2, window_bounds = array<i64: 2, 4>}, {transform_indices = @transform_3, window_bounds = array<i64: 2, 4, 256>}]} {
    %c0 = arith.constant 0 : index
    %c0_0 = arith.constant 0 : index
    %c0_1 = arith.constant 0 : index
    %0 = vector.load %arg1[%c0, %c0_0, %c0_1] : memref<2x4x256xf32, #tpu.memory_space<vmem>>, vector<2x4x256xf32>
    %cst = arith.constant dense<0.000000e+00> : vector<2x4xf32>
    %1 = vector.multi_reduction <add>, %0, %cst [2] : vector<2x4x256xf32> to vector<2x4xf32>
    %cst_2 = arith.constant 3.906250e-03 : f32
    %2 = vector.broadcast %cst_2 : f32 to vector<2x4xf32>
    %3 = arith.mulf %1, %2 : vector<2x4xf32>
    %c0_3 = arith.constant 0 : index
    %c0_4 = arith.constant 0 : index
    %4 = vector.load %arg2[%c0_3, %c0_4] : memref<4x2xf32, #tpu.memory_space<vmem>>, vector<4x2xf32>
    %cst_5 = arith.constant dense<0.000000e+00> : vector<2x2xf32>
    %5 = tpu.matmul %3, %4, %cst_5 {dimension_numbers = #tpu.dot_dimension_numbers<[1], [0], [0], [1], [0, 0, 1, 1], [], []>} : vector<2x4xf32>, vector<4x2xf32>, vector<2x2xf32> -> vector<2x2xf32>
    %cst_6 = arith.constant 0.000000e+00 : f32
    %6 = vector.broadcast %cst_6 : f32 to vector<2x2xf32>
    %7 = arith.maximumf %5, %6 : vector<2x2xf32>
    %c0_7 = arith.constant 0 : index
    %c0_8 = arith.constant 0 : index
    %8 = vector.load %arg3[%c0_7, %c0_8] : memref<2x4xf32, #tpu.memory_space<vmem>>, vector<2x4xf32>
    %cst_9 = arith.constant dense<0.000000e+00> : vector<2x4xf32>
    %9 = tpu.matmul %7, %8, %cst_9 {dimension_numbers = #tpu.dot_dimension_numbers<[1], [0], [0], [1], [0, 0, 1, 1], [], []>} : vector<2x2xf32>, vector<2x4xf32>, vector<2x4xf32> -> vector<2x4xf32>
    %10 = arith.negf %9 : vector<2x4xf32>
    %11 = math.exp %10 : vector<2x4xf32>
    %cst_10 = arith.constant 1.000000e+00 : f32
    %12 = vector.broadcast %cst_10 : f32 to vector<2x4xf32>
    %13 = arith.addf %12, %11 : vector<2x4xf32>
    %14 = arith.divf %12, %13 : vector<2x4xf32>
    %c0_11 = arith.constant 0 : index
    %c0_12 = arith.constant 0 : index
    %c0_13 = arith.constant 0 : index
    %15 = vector.load %arg1[%c0_11, %c0_12, %c0_13] : memref<2x4x256xf32, #tpu.memory_space<vmem>>, vector<2x4x256xf32>
    %16 = vector.shape_cast %14 : vector<2x4xf32> to vector<2x4x1xf32>
    %17 = vector.broadcast %16 : vector<2x4x1xf32> to vector<2x4x256xf32>
    %18 = arith.mulf %15, %17 : vector<2x4x256xf32>
    %c0_14 = arith.constant 0 : index
    %c0_15 = arith.constant 0 : index
    %c0_16 = arith.constant 0 : index
    %19 = vector.load %arg4[%c0_14, %c0_15, %c0_16] : memref<2x4x256xf32, #tpu.memory_space<vmem>>, vector<2x4x256xf32>
    tpu.vector_store %arg4[%c0_14, %c0_15, %c0_16], %18 {strides = array<i32>} : memref<2x4x256xf32, #tpu.memory_space<vmem>>, vector<2x4x256xf32>,
    return
  }
  func.func @transform_0(%arg0: i32) -> (i32, i32, i32) {
    %c0_i32 = arith.constant 0 : i32
    %c0_i32_0 = arith.constant 0 : i32
    %c0_i32_1 = arith.constant 0 : i32
    return %arg0, %c0_i32, %c0_i32_0 : i32, i32, i32
  }
  func.func @transform_1(%arg0: i32) -> (i32, i32) {
    %c0_i32 = arith.constant 0 : i32
    %c0_i32_0 = arith.constant 0 : i32
    %c0_i32_1 = arith.constant 0 : i32
    return %c0_i32, %c0_i32_0 : i32, i32
  }
  func.func @transform_2(%arg0: i32) -> (i32, i32) {
    %c0_i32 = arith.constant 0 : i32
    %c0_i32_0 = arith.constant 0 : i32
    %c0_i32_1 = arith.constant 0 : i32
    return %c0_i32, %c0_i32_0 : i32, i32
  }
  func.func @transform_3(%arg0: i32) -> (i32, i32, i32) {
    %c0_i32 = arith.constant 0 : i32
    %c0_i32_0 = arith.constant 0 : i32
    %c0_i32_1 = arith.constant 0 : i32
    return %arg0, %c0_i32, %c0_i32_0 : i32, i32, i32
  }
}

</mosaic_0001>

<bundles_post_ra>
// kernel: tpu_custom_call.1
= control target key start
LH: loop header
LB: loop body
LE: loop exit
PB: predicated region body
PF: predicated region fallthrough
CT: control target
= control target key end

     0   :  { %8 = vsyncpa [#allocation3], 0  ;;  %s311_s0 = inlined_call_operand.hbm [shape: f32[2,4,256], index: 0, kind: input, shape index: {}]   ;;  %s312_s1 = inlined_call_operand.vmem [shape: f32[4,2], index: 1, kind: input, shape index: {}]   ;;  %s313_s2 = inlined_call_operand.vmem [shape: f32[2,4], index: 2, kind: input, shape index: {}]   ;;  %s314_s3 = inlined_call_operand.hbm [shape: f32[2,4,256], index: 3, kind: output, shape index: {}]  }
   0x1   :  { %9 = vsyncpa [#allocation4], 0  ;;  %s14_s14 = sshll.u32 %s311_s0, 4  ;;  %s260_s15 = smov [#allocation2]   ;;  %s15_s14 = int_to_ptr.hbm [resolvable:$true] %s14_s14 }
   0x2   :  { %s16_s16 = sshll.u32 %s260_s15, 4  ;;  %s261_s17 = smov 128   ;;  %s17_s16 = int_to_ptr.vmem [resolvable:$true] %s16_s16 }
   0x3   :  { %s262_s18 = smov 8  }
   0x4   :  { %22 = dma.hbm_to_vmem [thread:$0]  %s15_s14, 256, %s17_s16, [#allocation3], %s261_s17, %s261_s17, %s262_s18  }
   0x5   :  { %256 = dma.done.wait [#allocation3], 256  }
   0x6   :  { %257 = vsyncadd [#allocation3], 4294967040  ;;  %v291_v0 = vld [vmem:[#allocation2] sm:$0xff]  ;;  %v293_v1 = vld [vmem:[#allocation2 + $0x8] sm:$0xff]  ;;  %vm46_vm0 = vcmask 1043456   ;;  %v62_v14 = vlaneseq  ;;  %vm66_vm1 = vcmask 1041409  }
   0x7   :  { %35 = vst [vmem:[#allocation1] ss:$2 sm:$0xff] %v291_v0  ;;  %v59_v12 = vld [vmem:[%s312_s1] sm:$0xf]  ;;  %vm68_vm2 = vcmask 31744   ;;  %vm100_vm3 = vcmask 1041408  }
   0x8   :  { %39 = vst [vmem:[#allocation1 + $0x10] ss:$2 sm:$0xff] %v293_v1  ;;  %192 = vmatpush.msk.msra.mxu0 %vm46_vm0, %v59_v12  ;;  %v63_v15 = vand.u32 127, %v62_v14  ;;  %v95_v22 = vld [vmem:[%s313_s2] sm:$0x3]  ;;  %vm96_vm4 = vcmask 15360  }
   0x9   :  { %194 = vmatpush.msk.msra.mxu1 %vm100_vm3, %v95_v22  ;;  %v145_v25 = vshrl.u32 %v62_v14, 7  ;;  %v263_v42 = vmov 839922192   ;;  %s264_s1 = smov [#allocation5]   ;;  %s179_s24 = sshll.u32 %s314_s3, 4  ;;  %s180_s24 = int_to_ptr.hbm [resolvable:$true] %s179_s24 }
   0xa   :  { %v160_v43 = vunpack.c.l.s4 %v263_v42  ;;  %s177_s2 = sshll.u32 %s264_s1, 4  ;;  %s178_s2 = int_to_ptr.vmem [resolvable:$true] %s177_s2 }
   0xb   :  { %202 = vset.pattern.permute.xlu1 %v145_v25  ;;  %203 = vset.pattern.permute.xlu0 %v145_v25 }
   0xc   :  { %v161_v44 = vunpack.c.0.s8 %v160_v43 }
   0xe   :  { %v36_v2 = vld.sshfl [vmem:[#allocation1] sm:$0xff pattern:$0x75316420]  ;;  %v37_v3 = vld.sshfl [vmem:[#allocation1 + $0x8] sm:$0xff pattern:$0x75316420] }
   0xf   :  { %v47_v4 = vsel %vm46_vm0, %v36_v2, 0.0  ;;  %v48_v5 = vsel %vm46_vm0, %v37_v3, 0.0  ;;  %v40_v7 = vld.sshfl [vmem:[#allocation1 + $0x10] sm:$0xff pattern:$0x75316420] }
  0x10   :  { %v49_v6 = vadd.f32 %v48_v5, %v47_v4  ;;  %v41_v8 = vld.sshfl [vmem:[#allocation1 + $0x18] sm:$0xff pattern:$0x75316420]  ;;  %v52_v9 = vsel %vm46_vm0, %v40_v7, 0.0 }
  0x11   :  { %v53_v10 = vsel %vm46_vm0, %v41_v8, 0.0 }
  0x12   :  { %50 = vadd.xlane.f32.xlu0 %v49_v6  ;;  %v54_v11 = vadd.f32 %v53_v10, %v52_v9 }
  0x1a   :  { %55 = vadd.xlane.f32.xlu0 %v54_v11 }
  0x85   :  { %v51_v13 = vpop.xlane.xlu0 %50 }
  0x86   :  { %v57_v16 = vmul.f32 0.00390625, %v51_v13 }
  0x88   :  { %v64_v19 = vperm.slane %v57_v16, %v63_v15 }
  0x8d   :  { %v56_v17 = vpop.xlane.xlu0 %55 }
  0x8e   :  { %v58_v18 = vmul.f32 0.00390625, %v56_v17 }
  0x90   :  { %v65_v20 = vperm.slane %v58_v18, %v63_v15 }
  0x92   :  { %v67_v21 = vsel %vm66_vm1, %v65_v20, %v64_v19 }
  0x93   :  { %193 = vmatmul.msk.f32.vlgmr.msra.gmra.mxu0 %vm68_vm2, %v67_v21 }
 0x110   :  { %v91_v23 = vpop.f32.mrf.mxu0 }
 0x111   :  { %v94_v24 = vmax.f32 %v91_v23, 0.0 }
 0x113   :  { %195 = vmatmul.msk.f32.vlgmr.msra.gmra.mxu1 %vm96_vm4, %v94_v24 }
 0x190   :  { %v121_v26 = vpop.f32.mrf.mxu1 }
 0x191   :  { %v196_v27 = vmul.f32 -1.442695, %v121_v26 }
 0x193   :  { %204 = vpow2.f32 %v196_v27 }
 0x199   :  { %v205_v28 = vpop.eup %204 }
 0x19a   :  { %v127_v29 = vadd.f32 1.0, %v205_v28 }
 0x19c   :  { %206 = vrcp.f32 %v127_v29  ;;  %v139_v33 = vand.u32 2147483648, %v127_v29  ;;  %v137_v35 = vand.u32 2147483647, %v127_v29  ;;  %vm133_vm6 = vweird.f32 %v127_v29 }
 0x19e   :  { %v140_v37 = vor.u32 1.1754944e-38, %v139_v33  ;;  %vm138_vm8 = vcmp.eq.f32.partialorder %v137_v35, 8.507059e+37 }
 0x1a2   :  { %v207_v30 = vpop.eup %206 }
 0x1a3   :  { %v129_v31 = vmul.f32 %v207_v30, %v127_v29  ;;  %vm134_vm5 = vweird.f32 %v207_v30 }
 0x1a4   :  { %vm135_vm7 = vmor %vm133_vm6, %vm134_vm5 }
 0x1a5   :  { %v130_v32 = vsub.f32 1.0, %v129_v31 }
 0x1a7   :  { %v131_v34 = vmul.f32 %v207_v30, %v130_v32 }
 0x1a9   :  { %v132_v36 = vadd.f32 %v207_v30, %v131_v34 }
 0x1ab   :  { %v136_v38 = vsel %vm135_vm7, %v207_v30, %v132_v36 }
 0x1ac   :  { %v141_v39 = vsel %vm138_vm8, %v140_v37, %v136_v38 }
 0x1ad   :  { %v143_v40 = vperm.slane %v141_v39, 0  ;;  %v150_v41 = vperm.slane %v141_v39, 1 }
 0x1af   :  { %148 = vperm.xlu1 %202, %v143_v40  }
 0x1b7   :  { %155 = vperm.xlu1 %202, %v150_v41  }
 0x221   :  { %v149_v45 = vpop.permute.xlu1 %148 }
 0x222   :  { %v162_v46 = vperm.slane %v149_v45, %v161_v44 }
 0x224   :  { %v169_v47 = vmul.f32 %v162_v46, %v291_v0 }
 0x226   :  { %171 = vst [vmem:[#allocation5] sm:$0xff] %v169_v47 }
 0x229   :  { %v156_v48 = vpop.permute.xlu1 %155 }
 0x22a   :  { %v166_v49 = vperm.slane %v156_v48, %v161_v44 }
 0x22c   :  { %v170_v50 = vmul.f32 %v166_v49, %v293_v1 }
 0x22e   :  { %172 = vst [vmem:[#allocation5 + $0x8] sm:$0xff] %v170_v50 }
 0x22f   :  { %185 = dma.vmem_to_hbm [thread:$0]  %s178_s2, 256, %s180_s24, [#allocation4], %s261_s17, %s261_s17, %s262_s18  }
 0x230   :  { %258 = dma.done.wait [#allocation4], 256  }
 0x231   :  { %259 = vsyncadd [#allocation4], 4294967040 }
 0x232   :  { %190 = vsyncpa [#allocation3], 1 }
 0x233   :  { %191 = vsyncpa [#allocation4], 1 }

</bundles_post_ra>
